<compile_context>
chip_gen: v7x
topology: tpu7x:2x2x1
jax: 0.10.0
libtpu: 0.0.40
codegen_flags: <defaults>
</compile_context>

<pallas_src>
import functools

import jax
import jax.numpy as jnp
import numpy as np
from jax.experimental import pallas as pl
from jax.experimental.pallas import tpu as pltpu


_VMEM_TILE_BUDGET = 40 * 1024 * 1024   # tiling budget for the streamed path
_VMEM_LIMIT = 48 * 1024 * 1024         # scoped-VMEM cap handed to Mosaic
_POINT_VMEM_BUDGET = 24 * 1024 * 1024  # budget for the 11-stream point path


def _round_up(x, m):
    return (x + m - 1) // m * m


def _sigmoid(x):
    return 1.0 / (1.0 + jnp.exp(-x))


# ---------------------------------------------------------------------------
# Kernels
# ---------------------------------------------------------------------------
def _point_kernel(se_ref, rh_ref, oe_ref, rt_ref, sdm_ref, rdm_ref, odm_ref,
                  st_ref, rht_ref, ot_ref, rtt_ref, out_ref, *, psi, mult):
    """Per-triple scoring.  Input refs (TILE_B, D) bf16; out (TILE_B, 1) f32.

    bf16 streams (halved HBM bytes), f32 accumulation, fused sigmoid epilogue
    with a single EUP approx reciprocal (exp + rcp ride the EUP slot).
    """
    f32 = jnp.float32
    se, rh = se_ref[...].astype(f32), rh_ref[...].astype(f32)
    oe, rt = oe_ref[...].astype(f32), rt_ref[...].astype(f32)
    sdm = sdm_ref[...].astype(f32)
    rdm = rdm_ref[...].astype(f32)
    odm = odm_ref[...].astype(f32)
    st, rht = st_ref[...].astype(f32), rht_ref[...].astype(f32)
    ot, rtt = ot_ref[...].astype(f32), rtt_ref[...].astype(f32)

    base = jnp.sum(se * rh + oe * rt + sdm * rdm * odm, axis=-1, keepdims=True)
    head = jnp.sum(st * rht, axis=-1, keepdims=True)
    tail = jnp.sum(ot * rtt, axis=-1, keepdims=True)

    den = ((1.0 + jnp.exp(-psi * base))
           * (1.0 + jnp.exp(-psi * head))
           * (1.0 + jnp.exp(-psi * tail)))
    out_ref[...] = mult * pl.reciprocal(den, approx=True)


def _all_entities_kernel(lhs_base_ref, lhs_type_ref, bias_ref, scale_ref,
                         tab_ref, out_ref, *, psi, d):
    """Score one (TILE_B, TILE_E) output tile.

    lhs_base (TILE_B, 2D) bf16 : concat([r_all, g_dm * r_dm], -1)   (per-B-tile)
    lhs_type (TILE_B,  D) bf16 : relation row paired with the free side
    bias     (TILE_B,  1) f32  : sum(g_e * r_given)
    scale    (TILE_B,  1) f32  : mult * sig(psi * sum(g_t * r_tgiven))
    tab      (3D, TILE_E) bf16 : pre-transposed [E || E_DM || E_t] slab (streamed)
    out      (TILE_B, TILE_E) f32
    """
    d2 = 2 * d
    # Contraction dim of the streamed RHS is on sublanes; entity dim on lanes
    # → MXU-native, no in-kernel transpose.  Static ref slices are free
    # (2D a multiple of the bf16 sublane pack when D % 8 == 0).
    base = jax.lax.dot_general(
        lhs_base_ref[...], tab_ref[pl.ds(0, d2), :],
        dimension_numbers=(((1,), (0,)), ((), ())),
        preferred_element_type=jnp.float32)                   # (TILE_B, TILE_E)
    typ = jax.lax.dot_general(
        lhs_type_ref[...], tab_ref[pl.ds(d2, d), :],
        dimension_numbers=(((1,), (0,)), ((), ())),
        preferred_element_type=jnp.float32)                   # (TILE_B, TILE_E)

    den = ((1.0 + jnp.exp(-psi * (base + bias_ref[...])))
           * (1.0 + jnp.exp(-psi * typ)))
    out_ref[...] = scale_ref[...] * pl.reciprocal(den, approx=True)


# ---------------------------------------------------------------------------
# pallas_call wrappers
# ---------------------------------------------------------------------------
def _point_scores(psi, mult, *ops):
    """ops: 11 arrays of shape (B, D) f32 — see _point_kernel.  Returns (B, 1)."""
    B, D = ops[0].shape
    # Size tile_b so 11 bf16 inputs x 2 buffers (+ output) fit the budget.
    per_row = 2 * (11 * D * 2 + 4)
    tile_b = max(8, min(512, _POINT_VMEM_BUDGET // per_row, _round_up(B, 8)))
    tile_b = (tile_b // 8) * 8
    bp = _round_up(B, tile_b)

    ops = tuple(x.astype(jnp.bfloat16) for x in ops)
    if bp != B:
        ops = tuple(jnp.pad(x, ((0, bp - B), (0, 0))) for x in ops)

    kernel = functools.partial(_point_kernel, psi=psi, mult=mult)
    out = pl.pallas_call(
        kernel,
        grid=(bp // tile_b,),
        in_specs=[pl.BlockSpec((tile_b, D), lambda i: (i, 0))
                  for _ in range(len(ops))],
        out_specs=pl.BlockSpec((tile_b, 1), lambda i: (i, 0)),
        out_shape=jax.ShapeDtypeStruct((bp, 1), jnp.float32),
        compiler_params=pltpu.CompilerParams(
            dimension_semantics=("parallel",),
            vmem_limit_bytes=_VMEM_LIMIT),
    )(*ops)
    return out[:B]


def _all_entity_scores(psi, lhs_base, lhs_type, bias, scale, tab,
                       entity_count, tile_e, tile_b_max):
    """Returns (B, entity_count) scores; grid = (B tiles, E tiles)."""
    B, D2 = lhs_base.shape
    D = lhs_type.shape[1]
    Ep = tab.shape[1]

    tile_b = max(8, min(tile_b_max, _round_up(B, 8)))
    tile_b = (tile_b // 8) * 8
    bp = _round_up(B, tile_b)
    if bp != B:
        pad = ((0, bp - B), (0, 0))
        lhs_base = jnp.pad(lhs_base, pad)
        lhs_type = jnp.pad(lhs_type, pad)
        bias = jnp.pad(bias, pad)
        scale = jnp.pad(scale, pad)

    kernel = functools.partial(_all_entities_kernel, psi=psi, d=D)
    # Entity axis innermost: the small per-B-tile LHS blocks keep a constant
    # block index across it (no re-DMA), the fused table slab streams.
    # TODO(synk): on v7x consider pipeline_mode=pl.Buffered(1) for the four
    # resident inputs and an fp8 table slab (accuracy-gated).
    out = pl.pallas_call(
        kernel,
        grid=(bp // tile_b, Ep // tile_e),
        in_specs=[
            pl.BlockSpec((tile_b, D2), lambda bi, ei: (bi, 0)),    # lhs_base
            pl.BlockSpec((tile_b, D), lambda bi, ei: (bi, 0)),     # lhs_type
            pl.BlockSpec((tile_b, 1), lambda bi, ei: (bi, 0)),     # bias
            pl.BlockSpec((tile_b, 1), lambda bi, ei: (bi, 0)),     # scale
            pl.BlockSpec((3 * D, tile_e), lambda bi, ei: (0, ei)),  # fused slab
        ],
        out_specs=pl.BlockSpec((tile_b, tile_e), lambda bi, ei: (bi, ei)),
        out_shape=jax.ShapeDtypeStruct((bp, Ep), jnp.float32),
        compiler_params=pltpu.CompilerParams(
            dimension_semantics=("parallel", "parallel"),
            vmem_limit_bytes=_VMEM_LIMIT),
    )(lhs_base, lhs_type, bias, scale, tab)
    return out[:B, :entity_count]


def _pick_tile_e(entity_count, d, tile_b, budget_bytes):
    """Largest multiple-of-128 entity tile whose pipeline footprint fits budget."""
    e_cap = _round_up(entity_count, 128)
    resident = 2 * tile_b * (3 * d) * 2 + 2 * 2 * tile_b * 4        # LHS blocks
    per_e = 2 * (3 * d) * 2 + 4 * tile_b * 4     # streamed slab + out + temps
    tile_e = max(128, (budget_bytes - resident) // per_e)
    tile_e = (tile_e // 128) * 128
    return int(min(tile_e, e_cap))


# ---------------------------------------------------------------------------
# Base model (DME) — holds its embedding tables; scoring is fused into the
# image_model kernels above (no extra (B, E) round trip through HBM).
# Clamp is applied symmetrically to every looked-up embedding so the
# per-triple and all-entities paths agree when clamp_v is set.
# ---------------------------------------------------------------------------
class DME:
    def __init__(self, entity_count, relation_count, embedding_dim, key,
                 clamp_v=None):
        self.entity_count = entity_count
        self.relation_count = relation_count
        self.embedding_dim = embedding_dim
        self.clamp_v = clamp_v
        ks = jax.random.split(key, 5)
        norm = lambda k, n: (0.05 * jax.random.normal(
            k, (n, embedding_dim))).astype(jnp.float32)
        self.E_DM = norm(ks[0], entity_count)
        self.R_DM = norm(ks[1], relation_count)
        self.E = norm(ks[2], entity_count)
        self.R_head = norm(ks[3], relation_count)
        self.R_tail = norm(ks[4], relation_count)

    def _clamp(self, x):
        if self.clamp_v:
            return jnp.clip(x, -self.clamp_v, self.clamp_v)
        return x


# ---------------------------------------------------------------------------
# image_model
# ---------------------------------------------------------------------------
class ImageModel:
    def __init__(self, entity_count, relation_count, embedding_dim,
                 base_model_name, base_model_arguments, key,
                 unit_reg=True, mult=20.0, psi=1.0,
                 image_compatibility_coefficient=0, image_embedding=None,
                 tile_b_max=256):
        base_model_class = globals()[base_model_name]
        base_model_arguments = dict(base_model_arguments)
        base_model_arguments["entity_count"] = entity_count
        base_model_arguments["relation_count"] = relation_count
        ks = jax.random.split(key, 6)
        base_model_arguments["key"] = ks[0]
        self.base_model = base_model_class(**base_model_arguments)

        self.embedding_dim = embedding_dim
        self.entity_count = entity_count
        self.relation_count = relation_count
        self.unit_reg = unit_reg
        self.mult = float(mult)
        self.psi = float(psi)
        self.minimum_value = 0.0
        self.image_compatibility_coefficient = image_compatibility_coefficient

        norm = lambda k, n, d: (0.05 * jax.random.normal(
            k, (n, d))).astype(jnp.float32)
        self.E_t = norm(ks[1], entity_count, embedding_dim)
        self.R_ht = norm(ks[2], relation_count, embedding_dim)
        self.R_tt = norm(ks[3], relation_count, embedding_dim)

        # Image branch parameters (only used by image_compatibility(), not forward()).
        img_dim = image_embedding.shape[-1]
        self.image_embedding = jnp.asarray(image_embedding, dtype=jnp.float32)
        self.linear_w = norm(ks[4], embedding_dim, img_dim)
        self.linear_b = jnp.zeros((embedding_dim,), jnp.float32)
        self.bn_gamma = jnp.ones((embedding_dim,), jnp.float32)
        self.bn_beta = jnp.zeros((embedding_dim,), jnp.float32)
        # TODO(synk): image_compatibility() (train-mode BatchNorm1d), regularizer()
        # and post_epoch() are not part of forward() and are not implemented as
        # Pallas kernels here.

        # All-entities scoring cache: one fused, pre-transposed, clamped slab
        # [E || E_DM || E_t] of shape (3D, E_pad), bf16.  tile_e is sized from
        # an explicit VMEM budget (double-buffered streamed slab + output +
        # epilogue temps + resident LHS).
        self._tile_b_max = tile_b_max
        self._tile_e = _pick_tile_e(entity_count, embedding_dim,
                                    tile_b_max, _VMEM_TILE_BUDGET)
        self._refresh_scoring_cache()

    def _refresh_scoring_cache(self):
        # TODO(synk): call again after any training update / post_epoch renorm —
        # otherwise the all-entities path silently uses stale tables.
        bm = self.base_model
        e_pad = _round_up(self.entity_count, self._tile_e)
        tab = jnp.concatenate(
            [bm._clamp(bm.E), bm._clamp(bm.E_DM), self.E_t], axis=-1)  # (E, 3D)
        if e_pad != self.entity_count:
            tab = jnp.pad(tab, ((0, e_pad - self.entity_count), (0, 0)))
        # Pre-transposed so the contraction dim is on sublanes and the entity
        # (output) dim is lane-dense — MXU consumes it with no XLU transposes.
        self._tab = jnp.asarray(tab.T, dtype=jnp.bfloat16)             # (3D, E_pad)

    def forward(self, s, r, o):
        bm = self.base_model
        r_idx = r.reshape(-1)
        r_dm = bm._clamp(bm.R_DM[r_idx])
        r_head = bm._clamp(bm.R_head[r_idx])
        r_tail = bm._clamp(bm.R_tail[r_idx])
        r_ht = self.R_ht[r_idx]
        r_tt = self.R_tt[r_idx]

        if s is None and o is None:
            # TODO(synk): both-None path not implemented (matches previous behaviour).
            raise NotImplementedError("s and o cannot both be None")

        if s is not None and o is not None:
            # Per-triple scoring -> (B, 1).
            s_idx = s.reshape(-1)
            o_idx = o.reshape(-1)
            s_e = bm._clamp(bm.E[s_idx])
            o_e = bm._clamp(bm.E[o_idx])
            s_dm = bm._clamp(bm.E_DM[s_idx])
            o_dm = bm._clamp(bm.E_DM[o_idx])
            s_t = self.E_t[s_idx]
            o_t = self.E_t[o_idx]
            return _point_scores(self.psi, self.mult,
                                 s_e, r_head, o_e, r_tail,
                                 s_dm, r_dm, o_dm,
                                 s_t, r_ht, o_t, r_tt)

        # Score against ALL entities on the missing side -> (B, entity_count).
        if o is None:                      # s given, all tails
            g_idx = s.reshape(-1)
            r_given, r_all = r_head, r_tail
            r_tgiven, r_tall = r_ht, r_tt
        else:                              # o given, all heads
            g_idx = o.reshape(-1)
            r_given, r_all = r_tail, r_head
            r_tgiven, r_tall = r_tt, r_ht

        g_e = bm._clamp(bm.E[g_idx])
        g_dm = bm._clamp(bm.E_DM[g_idx])
        g_t = self.E_t[g_idx]

        # Grid-invariant per-row terms computed once here (not per E-tile).
        bias = jnp.sum(g_e * r_given, axis=-1, keepdims=True)            # (B, 1)
        scale = self.mult * _sigmoid(
            self.psi * jnp.sum(g_t * r_tgiven, axis=-1, keepdims=True))  # (B, 1)
        # DistMult factors multiplied in f32, cast to bf16 once (matmul LHS).
        lhs_base = jnp.concatenate([r_all, g_dm * r_dm],
                                   axis=-1).astype(jnp.bfloat16)         # (B, 2D)
        lhs_type = r_tall.astype(jnp.bfloat16)                           # (B, D)

        return _all_entity_scores(self.psi, lhs_base, lhs_type, bias, scale,
                                  self._tab, self.entity_count,
                                  self._tile_e, self._tile_b_max)


# ---------------------------------------------------------------------------
# Pure-JAX reference (mirrors the PyTorch broadcasting exactly)
# ---------------------------------------------------------------------------
def ref_forward(model, s, r, o):
    bm = model.base_model

    def lk(W, idx):
        if idx is None:
            return W[None, :, :]
        return W[idx.reshape(-1)][:, None, :]

    r_idx = r.reshape(-1)
    s_dm = lk(bm.E_DM, s)
    o_dm = lk(bm.E_DM, o)
    r_dm = bm.R_DM[r_idx][:, None, :]
    s_e = lk(bm.E, s)
    o_e = lk(bm.E, o)
    r_h = bm.R_head[r_idx][:, None, :]
    r_t = bm.R_tail[r_idx][:, None, :]
    base = ((s_e * r_h + o_e * r_t).sum(-1) + (s_dm * r_dm * o_dm).sum(-1))

    s_t = lk(model.E_t, s)
    o_t = lk(model.E_t, o)
    r_ht = model.R_ht[r_idx][:, None, :]
    r_tt = model.R_tt[r_idx][:, None, :]
    head = (s_t * r_ht).sum(-1)
    tail = (o_t * r_tt).sum(-1)

    return (model.mult * _sigmoid(model.psi * base)
            * _sigmoid(model.psi * head) * _sigmoid(model.psi * tail))


# ---------------------------------------------------------------------------
if __name__ == "__main__":
    key = jax.random.PRNGKey(0)
    k_param, k_img, k_s, k_r, k_o = jax.random.split(key, 5)

    entity_count, relation_count, embedding_dim, batch = 64, 16, 32, 8
    image_dim = 24
    image_embedding = np.asarray(
        0.05 * jax.random.normal(k_img, (entity_count - 1, image_dim)),
        dtype=np.float32)

    model = ImageModel(
        entity_count, relation_count, embedding_dim,
        base_model_name="DME",
        base_model_arguments={"embedding_dim": embedding_dim, "clamp_v": None},
        key=k_param, mult=20.0, psi=1.0,
        image_embedding=image_embedding)

    s = jax.random.randint(k_s, (batch, 1), 0, entity_count, dtype=jnp.int32)
    r = jax.random.randint(k_r, (batch, 1), 0, relation_count, dtype=jnp.int32)
    o = jax.random.randint(k_o, (batch, 1), 0, entity_count, dtype=jnp.int32)

    # 1) per-triple scoring (s, r, o all given) -> (B, 1)   [bf16 streams]
    out_point = jax.block_until_ready(model.forward(s, r, o))
    ref_point = ref_forward(model, s, r, o)
    assert out_point.shape == (batch, 1)
    np.testing.assert_allclose(np.asarray(out_point), np.asarray(ref_point),
                               rtol=5e-3, atol=5e-3)

    # 2) score against all tail entities (o = None) -> (B, E)  [bf16 matmuls]
    out_all_t = jax.block_until_ready(model.forward(s, r, None))
    ref_all_t = ref_forward(model, s, r, None)
    assert out_all_t.shape == (batch, entity_count)
    np.testing.assert_allclose(np.asarray(out_all_t), np.asarray(ref_all_t),
                               rtol=5e-3, atol=5e-3)

    # 3) score against all head entities (s = None) -> (B, E)
    out_all_h = jax.block_until_ready(model.forward(None, r, o))
    ref_all_h = ref_forward(model, None, r, o)
    assert out_all_h.shape == (batch, entity_count)
    np.testing.assert_allclose(np.asarray(out_all_h), np.asarray(ref_all_h),
                               rtol=5e-3, atol=5e-3)

    print("KERNEL_OK")
</pallas_src>

<mosaic_0001>
module attributes {stable_mosaic.version = 11 : i64} {
  func.func @_point_kernel(%arg0: i32, %arg1: memref<8x32xbf16, #tpu.memory_space<vmem>>, %arg2: memref<8x32xbf16, #tpu.memory_space<vmem>>, %arg3: memref<8x32xbf16, #tpu.memory_space<vmem>>, %arg4: memref<8x32xbf16, #tpu.memory_space<vmem>>, %arg5: memref<8x32xbf16, #tpu.memory_space<vmem>>, %arg6: memref<8x32xbf16, #tpu.memory_space<vmem>>, %arg7: memref<8x32xbf16, #tpu.memory_space<vmem>>, %arg8: memref<8x32xbf16, #tpu.memory_space<vmem>>, %arg9: memref<8x32xbf16, #tpu.memory_space<vmem>>, %arg10: memref<8x32xbf16, #tpu.memory_space<vmem>>, %arg11: memref<8x32xbf16, #tpu.memory_space<vmem>>, %arg12: memref<8x1xf32, #tpu.memory_space<vmem>>) attributes {dimension_semantics = [#tpu.dimension_semantics<parallel>], iteration_bounds = array<i64: 1>, scalar_prefetch = 0 : i64, scratch_operands = 0 : i64, tpu.core_type = #tpu.core_type<tc>, window_params = [{transform_indices = @transform_0, window_bounds = array<i64: 8, 32>}, {transform_indices = @transform_1, window_bounds = array<i64: 8, 32>}, {transform_indices = @transform_2, window_bounds = array<i64: 8, 32>}, {transform_indices = @transform_3, window_bounds = array<i64: 8, 32>}, {transform_indices = @transform_4, window_bounds = array<i64: 8, 32>}, {transform_indices = @transform_5, window_bounds = array<i64: 8, 32>}, {transform_indices = @transform_6, window_bounds = array<i64: 8, 32>}, {transform_indices = @transform_7, window_bounds = array<i64: 8, 32>}, {transform_indices = @transform_8, window_bounds = array<i64: 8, 32>}, {transform_indices = @transform_9, window_bounds = array<i64: 8, 32>}, {transform_indices = @transform_10, window_bounds = array<i64: 8, 32>}, {transform_indices = @transform_11, window_bounds = array<i64: 8, 1>}]} {
    %c0 = arith.constant 0 : index
    %c0_0 = arith.constant 0 : index
    %0 = vector.load %arg1[%c0, %c0_0] : memref<8x32xbf16, #tpu.memory_space<vmem>>, vector<8x32xbf16>
    %1 = arith.extf %0 : vector<8x32xbf16> to vector<8x32xf32>
    %c0_1 = arith.constant 0 : index
    %c0_2 = arith.constant 0 : index
    %2 = vector.load %arg2[%c0_1, %c0_2] : memref<8x32xbf16, #tpu.memory_space<vmem>>, vector<8x32xbf16>
    %3 = arith.extf %2 : vector<8x32xbf16> to vector<8x32xf32>
    %c0_3 = arith.constant 0 : index
    %c0_4 = arith.constant 0 : index
    %4 = vector.load %arg3[%c0_3, %c0_4] : memref<8x32xbf16, #tpu.memory_space<vmem>>, vector<8x32xbf16>
    %5 = arith.extf %4 : vector<8x32xbf16> to vector<8x32xf32>
    %c0_5 = arith.constant 0 : index
    %c0_6 = arith.constant 0 : index
    %6 = vector.load %arg4[%c0_5, %c0_6] : memref<8x32xbf16, #tpu.memory_space<vmem>>, vector<8x32xbf16>
    %7 = arith.extf %6 : vector<8x32xbf16> to vector<8x32xf32>
    %c0_7 = arith.constant 0 : index
    %c0_8 = arith.constant 0 : index
    %8 = vector.load %arg5[%c0_7, %c0_8] : memref<8x32xbf16, #tpu.memory_space<vmem>>, vector<8x32xbf16>
    %9 = arith.extf %8 : vector<8x32xbf16> to vector<8x32xf32>
    %c0_9 = arith.constant 0 : index
    %c0_10 = arith.constant 0 : index
    %10 = vector.load %arg6[%c0_9, %c0_10] : memref<8x32xbf16, #tpu.memory_space<vmem>>, vector<8x32xbf16>
    %11 = arith.extf %10 : vector<8x32xbf16> to vector<8x32xf32>
    %c0_11 = arith.constant 0 : index
    %c0_12 = arith.constant 0 : index
    %12 = vector.load %arg7[%c0_11, %c0_12] : memref<8x32xbf16, #tpu.memory_space<vmem>>, vector<8x32xbf16>
    %13 = arith.extf %12 : vector<8x32xbf16> to vector<8x32xf32>
    %c0_13 = arith.constant 0 : index
    %c0_14 = arith.constant 0 : index
    %14 = vector.load %arg8[%c0_13, %c0_14] : memref<8x32xbf16, #tpu.memory_space<vmem>>, vector<8x32xbf16>
    %15 = arith.extf %14 : vector<8x32xbf16> to vector<8x32xf32>
    %c0_15 = arith.constant 0 : index
    %c0_16 = arith.constant 0 : index
    %16 = vector.load %arg9[%c0_15, %c0_16] : memref<8x32xbf16, #tpu.memory_space<vmem>>, vector<8x32xbf16>
    %17 = arith.extf %16 : vector<8x32xbf16> to vector<8x32xf32>
    %c0_17 = arith.constant 0 : index
    %c0_18 = arith.constant 0 : index
    %18 = vector.load %arg10[%c0_17, %c0_18] : memref<8x32xbf16, #tpu.memory_space<vmem>>, vector<8x32xbf16>
    %19 = arith.extf %18 : vector<8x32xbf16> to vector<8x32xf32>
    %c0_19 = arith.constant 0 : index
    %c0_20 = arith.constant 0 : index
    %20 = vector.load %arg11[%c0_19, %c0_20] : memref<8x32xbf16, #tpu.memory_space<vmem>>, vector<8x32xbf16>
    %21 = arith.extf %20 : vector<8x32xbf16> to vector<8x32xf32>
    %22 = arith.mulf %1, %3 : vector<8x32xf32>
    %23 = arith.mulf %5, %7 : vector<8x32xf32>
    %24 = arith.addf %22, %23 : vector<8x32xf32>
    %25 = arith.mulf %9, %11 : vector<8x32xf32>
    %26 = arith.mulf %25, %13 : vector<8x32xf32>
    %27 = arith.addf %24, %26 : vector<8x32xf32>
    %cst = arith.constant dense<0.000000e+00> : vector<8xf32>
    %28 = vector.multi_reduction <add>, %27, %cst [1] : vector<8x32xf32> to vector<8xf32>
    %29 = vector.shape_cast %28 : vector<8xf32> to vector<8x1xf32>
    %30 = arith.mulf %15, %17 : vector<8x32xf32>
    %cst_21 = arith.constant dense<0.000000e+00> : vector<8xf32>
    %31 = vector.multi_reduction <add>, %30, %cst_21 [1] : vector<8x32xf32> to vector<8xf32>
    %32 = vector.shape_cast %31 : vector<8xf32> to vector<8x1xf32>
    %33 = arith.mulf %19, %21 : vector<8x32xf32>
    %cst_22 = arith.constant dense<0.000000e+00> : vector<8xf32>
    %34 = vector.multi_reduction <add>, %33, %cst_22 [1] : vector<8x32xf32> to vector<8xf32>
    %35 = vector.shape_cast %34 : vector<8xf32> to vector<8x1xf32>
    %cst_23 = arith.constant -1.000000e+00 : f32
    %36 = vector.broadcast %cst_23 : f32 to vector<8x1xf32>
    %37 = arith.mulf %36, %29 : vector<8x1xf32>
    %38 = math.exp %37 : vector<8x1xf32>
    %cst_24 = arith.constant 1.000000e+00 : f32
    %39 = vector.broadcast %cst_24 : f32 to vector<8x1xf32>
    %40 = arith.addf %39, %38 : vector<8x1xf32>
    %cst_25 = arith.constant -1.000000e+00 : f32
    %41 = vector.broadcast %cst_25 : f32 to vector<8x1xf32>
    %42 = arith.mulf %41, %32 : vector<8x1xf32>
    %43 = math.exp %42 : vector<8x1xf32>
    %cst_26 = arith.constant 1.000000e+00 : f32
    %44 = vector.broadcast %cst_26 : f32 to vector<8x1xf32>
    %45 = arith.addf %44, %43 : vector<8x1xf32>
    %46 = arith.mulf %40, %45 : vector<8x1xf32>
    %cst_27 = arith.constant -1.000000e+00 : f32
    %47 = vector.broadcast %cst_27 : f32 to vector<8x1xf32>
    %48 = arith.mulf %47, %35 : vector<8x1xf32>
    %49 = math.exp %48 : vector<8x1xf32>
    %cst_28 = arith.constant 1.000000e+00 : f32
    %50 = vector.broadcast %cst_28 : f32 to vector<8x1xf32>
    %51 = arith.addf %50, %49 : vector<8x1xf32>
    %52 = arith.mulf %46, %51 : vector<8x1xf32>
    %53 = tpu.reciprocal %52 {approx = true} : vector<8x1xf32> -> vector<8x1xf32>
    %cst_29 = arith.constant 2.000000e+01 : f32
    %54 = vector.broadcast %cst_29 : f32 to vector<8x1xf32>
    %55 = arith.mulf %54, %53 : vector<8x1xf32>
    %c0_30 = arith.constant 0 : index
    %c0_31 = arith.constant 0 : index
    %56 = vector.load %arg12[%c0_30, %c0_31] : memref<8x1xf32, #tpu.memory_space<vmem>>, vector<8x1xf32>
    tpu.vector_store %arg12[%c0_30, %c0_31], %55 {strides = array<i32>} : memref<8x1xf32, #tpu.memory_space<vmem>>, vector<8x1xf32>,
    return
  }
  func.func @transform_0(%arg0: i32) -> (i32, i32) {
    %c0_i32 = arith.constant 0 : i32
    %c0_i32_0 = arith.constant 0 : i32
    return %arg0, %c0_i32 : i32, i32
  }
  func.func @transform_1(%arg0: i32) -> (i32, i32) {
    %c0_i32 = arith.constant 0 : i32
    %c0_i32_0 = arith.constant 0 : i32
    return %arg0, %c0_i32 : i32, i32
  }
  func.func @transform_2(%arg0: i32) -> (i32, i32) {
    %c0_i32 = arith.constant 0 : i32
    %c0_i32_0 = arith.constant 0 : i32
    return %arg0, %c0_i32 : i32, i32
  }
  func.func @transform_3(%arg0: i32) -> (i32, i32) {
    %c0_i32 = arith.constant 0 : i32
    %c0_i32_0 = arith.constant 0 : i32
    return %arg0, %c0_i32 : i32, i32
  }
  func.func @transform_4(%arg0: i32) -> (i32, i32) {
    %c0_i32 = arith.constant 0 : i32
    %c0_i32_0 = arith.constant 0 : i32
    return %arg0, %c0_i32 : i32, i32
  }
  func.func @transform_5(%arg0: i32) -> (i32, i32) {
    %c0_i32 = arith.constant 0 : i32
    %c0_i32_0 = arith.constant 0 : i32
    return %arg0, %c0_i32 : i32, i32
  }
  func.func @transform_6(%arg0: i32) -> (i32, i32) {
    %c0_i32 = arith.constant 0 : i32
    %c0_i32_0 = arith.constant 0 : i32
    return %arg0, %c0_i32 : i32, i32
  }
  func.func @transform_7(%arg0: i32) -> (i32, i32) {
    %c0_i32 = arith.constant 0 : i32
    %c0_i32_0 = arith.constant 0 : i32
    return %arg0, %c0_i32 : i32, i32
  }
  func.func @transform_8(%arg0: i32) -> (i32, i32) {
    %c0_i32 = arith.constant 0 : i32
    %c0_i32_0 = arith.constant 0 : i32
    return %arg0, %c0_i32 : i32, i32
  }
  func.func @transform_9(%arg0: i32) -> (i32, i32) {
    %c0_i32 = arith.constant 0 : i32
    %c0_i32_0 = arith.constant 0 : i32
    return %arg0, %c0_i32 : i32, i32
  }
  func.func @transform_10(%arg0: i32) -> (i32, i32) {
    %c0_i32 = arith.constant 0 : i32
    %c0_i32_0 = arith.constant 0 : i32
    return %arg0, %c0_i32 : i32, i32
  }
  func.func @transform_11(%arg0: i32) -> (i32, i32) {
    %c0_i32 = arith.constant 0 : i32
    %c0_i32_0 = arith.constant 0 : i32
    return %arg0, %c0_i32 : i32, i32
  }
}

</mosaic_0001>

<bundles_post_ra>
// kernel: tpu_custom_call.1
= control target key start
LH: loop header
LB: loop body
LE: loop exit
PB: predicated region body
PF: predicated region fallthrough
CT: control target
= control target key end

     0   :  { %16 = vsyncpa [#allocation3], 0  ;;  %s300_s0 = inlined_call_operand.hbm [shape: bf16[8,32], index: 0, kind: input, shape index: {}]   ;;  %s301_s1 = inlined_call_operand.hbm [shape: bf16[8,32], index: 1, kind: input, shape index: {}]   ;;  %s302_s2 = inlined_call_operand.vmem [shape: bf16[8,32], index: 2, kind: input, shape index: {}]   ;;  %s303_s3 = inlined_call_operand.vmem [shape: bf16[8,32], index: 3, kind: input, shape index: {}]   ;;  %s304_s4 = inlined_call_operand.vmem [shape: bf16[8,32], index: 4, kind: input, shape index: {}]   ;;  %s305_s5 = inlined_call_operand.vmem [shape: bf16[8,32], index: 5, kind: input, shape index: {}]   ;;  %s306_s6 = inlined_call_operand.vmem [shape: bf16[8,32], index: 6, kind: input, shape index: {}]   ;;  %s307_s7 = inlined_call_operand.vmem [shape: bf16[8,32], index: 7, kind: input, shape index: {}]   ;;  %s308_s8 = inlined_call_operand.vmem [shape: bf16[8,32], index: 8, kind: input, shape index: {}]   ;;  %s309_s9 = inlined_call_operand.vmem [shape: bf16[8,32], index: 9, kind: input, shape index: {}]   ;;  %s310_s10 = inlined_call_operand.vmem [shape: bf16[8,32], index: 10, kind: input, shape index: {}]   ;;  %s311_s11 = inlined_call_operand.vmem [shape: f32[8,1], index: 11, kind: output, shape index: {}]  }
   0x1   :  { %17 = vsyncpa [#allocation5], 0  ;;  %s184_s17 = smov [#allocation2]   ;;  %s185_s19 = smov [#allocation4]  }
   0x2   :  { %s24_s18 = sshll.u32 %s184_s17, 4  ;;  %s34_s20 = sshll.u32 %s185_s19, 4  ;;  %s25_s18 = int_to_ptr.vmem [resolvable:$true] %s24_s18  ;;  %s35_s20 = int_to_ptr.vmem [resolvable:$true] %s34_s20 }
   0x3   :  { %s136_s23 = scalar_lea.hbm %s300_s0, 64 }
   0x4   :  { %p137_p0 = scmp.ne.s32.totalorder %s300_s0, %s136_s23  ;;  %p140_p1 = scmp.lt.u32.totalorder %s136_s23, %s300_s0 }
   0x6   :  { %p142_p2 = pnand %p140_p1, %p137_p0 }
   0x8   :  { %145 = shalt.err (!%p142_p2)
}
   0x9   :  { %s146_s28 = scalar_lea.vmem %s25_s18, 64  ;;  %p151_p4 = scmp.lt.s32.totalorder %s25_s18, %s25_s18 }
   0xa   :  { %p147_p3 = scmp.ne.s32.totalorder %s25_s18, %s146_s28  ;;  %p152_p5 = scmp.lt.s32.totalorder %s146_s28, %s146_s28 }
   0xc   :  { %p153_p6 = por %p152_p5, %p151_p4 }
   0xe   :  { %p154_p7 = pnand %p153_p6, %p147_p3 }
  0x10   :  { %157 = shalt.err (!%p154_p7)
}
  0x11   :  { %27 = dma.hbm_to_vmem [thread:$0]  %s300_s0, 64, %s25_s18, [#allocation3]  }
  0x12   :  { %s158_s14 = scalar_lea.hbm %s301_s1, 64 }
  0x13   :  { %p159_p8 = scmp.ne.s32.totalorder %s301_s1, %s158_s14  ;;  %p162_p9 = scmp.lt.u32.totalorder %s158_s14, %s301_s1 }
  0x15   :  { %p164_p10 = pnand %p162_p9, %p159_p8 }
  0x17   :  { %167 = shalt.err (!%p164_p10)
}
  0x18   :  { %s168_s21 = scalar_lea.vmem %s35_s20, 64  ;;  %p173_p12 = scmp.lt.s32.totalorder %s35_s20, %s35_s20 }
  0x19   :  { %p169_p11 = scmp.ne.s32.totalorder %s35_s20, %s168_s21  ;;  %p174_p13 = scmp.lt.s32.totalorder %s168_s21, %s168_s21 }
  0x1b   :  { %p175_p0 = por %p174_p13, %p173_p12 }
  0x1d   :  { %p176_p1 = pnand %p175_p0, %p169_p11 }
  0x1f   :  { %179 = shalt.err (!%p176_p1)
}
  0x20   :  { %37 = dma.hbm_to_vmem [thread:$0]  %s301_s1, 64, %s35_s20, [#allocation5]  }
  0x21   :  { %180 = dma.done.wait [#allocation3], 64  }
  0x22   :  { %181 = vsyncadd [#allocation3], 4294967232 }
  0x23   :  { %182 = dma.done.wait [#allocation5], 64  }
  0x24   :  { %183 = vsyncadd [#allocation5], 4294967232  ;;  %v62_v0 = vld [vmem:[#allocation2] sm:$0xf]  ;;  %v64_v1 = vld [vmem:[#allocation4] sm:$0xf] }
  0x25   :  { %v66_v2 = vld [vmem:[%s302_s2] sm:$0xf]  ;;  %v63_v3 = vunpack.c.l.bf16 %v62_v0  ;;  %v65_v4 = vunpack.c.l.bf16 %v64_v1  ;;  %vm90_vm0 = vcmask 261120   ;;  %vm118_vm1 = vcmask 7168  }
  0x26   :  { %v67_v5 = vunpack.c.l.bf16 %v66_v2  ;;  %v68_v6 = vld [vmem:[%s303_s3] sm:$0xf] }
  0x27   :  { %v70_v7 = vld [vmem:[%s304_s4] sm:$0xf]  ;;  %v69_v9 = vunpack.c.l.bf16 %v68_v6  ;;  %v84_v16 = vmul.f32 %v65_v4, %v63_v3 }
  0x28   :  { %v72_v8 = vld [vmem:[%s305_s5] sm:$0xf]  ;;  %v71_v10 = vunpack.c.l.bf16 %v70_v7 }
  0x29   :  { %v73_v11 = vunpack.c.l.bf16 %v72_v8  ;;  %v74_v12 = vld [vmem:[%s306_s6] sm:$0xf]  ;;  %v85_v21 = vmul.f32 %v69_v9, %v67_v5 }
  0x2a   :  { %v76_v13 = vld [vmem:[%s307_s7] sm:$0xf]  ;;  %v75_v15 = vunpack.c.l.bf16 %v74_v12 }
  0x2b   :  { %v78_v14 = vld [vmem:[%s308_s8] sm:$0xf]  ;;  %v77_v17 = vunpack.c.l.bf16 %v76_v13  ;;  %v87_v22 = vmul.f32 %v73_v11, %v71_v10  ;;  %v86_v25 = vadd.f32 %v85_v21, %v84_v16 }
  0x2c   :  { %v79_v18 = vunpack.c.l.bf16 %v78_v14  ;;  %v80_v19 = vld [vmem:[%s309_s9] sm:$0xf] }
  0x2d   :  { %v82_v20 = vld [vmem:[%s310_s10] sm:$0xf]  ;;  %v81_v23 = vunpack.c.l.bf16 %v80_v19  ;;  %v88_v26 = vmul.f32 %v87_v22, %v75_v15 }
  0x2e   :  { %v83_v24 = vunpack.c.l.bf16 %v82_v20  ;;  %v94_v29 = vmul.f32 %v79_v18, %v77_v17 }
  0x2f   :  { %v89_v28 = vadd.f32 %v88_v26, %v86_v25 }
  0x30   :  { %v98_v27 = vmul.f32 %v83_v24, %v81_v23  ;;  %v95_v32 = vsel %vm90_vm0, %v94_v29, 0.0 }
  0x31   :  { %v91_v31 = vsel %vm90_vm0, %v89_v28, 0.0 }
  0x32   :  { %v99_v30 = vsel %vm90_vm0, %v98_v27, 0.0  ;;  %92 = vadd.xlane.f32.xlu0 %v91_v31 }
  0x33   :  { %100 = vadd.xlane.f32.xlu1 %v99_v30 }
  0x36   :  { %96 = vadd.xlane.f32.xlu0 %v95_v32 }
  0xbf   :  { %v93_v35 = vpop.xlane.xlu0 %92 }
  0xc0   :  { %v101_v33 = vpop.xlane.xlu1 %100  ;;  %v102_v36 = vmul.f32 -1.0, %v93_v35 }
  0xc1   :  { %v111_v34 = vmul.f32 -1.0, %v101_v33 }
  0xc2   :  { %v103_v38 = vmul.f32 1.442695, %v102_v36 }
  0xc3   :  { %v112_v37 = vmul.f32 1.442695, %v111_v34  ;;  %v97_v39 = vpop.xlane.xlu0 %96 }
  0xc4   :  { %v106_v40 = vmul.f32 -1.0, %v97_v39 }
  0xc5   :  { %128 = vpow2.f32 %v112_v37 }
  0xc6   :  { %130 = vpow2.f32 %v103_v38  ;;  %v107_v41 = vmul.f32 1.442695, %v106_v40 }
  0xc8   :  { %132 = vpow2.f32 %v107_v41 }
  0xcf   :  { %v129_v42 = vpop.eup %128 }
  0xd0   :  { %v131_v43 = vpop.eup %130  ;;  %v114_v47 = vadd.f32 1.0, %v129_v42 }
  0xd1   :  { %v105_v45 = vadd.f32 1.0, %v131_v43 }
  0xd2   :  { %v133_v44 = vpop.eup %132 }
  0xd3   :  { %v109_v46 = vadd.f32 1.0, %v133_v44 }
  0xd5   :  { %v110_v48 = vmul.f32 %v109_v46, %v105_v45 }
  0xd7   :  { %v115_v49 = vmul.f32 %v114_v47, %v110_v48 }
  0xd9   :  { %134 = vrcp.f32 %v115_v49 }
  0xe3   :  { %v135_v50 = vpop.eup %134 }
  0xe4   :  { %v117_v51 = vmul.f32 20.0, %v135_v50 }
  0xe6   :  { %119 = vst.msk [vmem:[%s311_s11] sm:$0xff] %vm118_vm1, %v117_v51 }
  0xe7   :  { %124 = vsyncpa [#allocation3], 1 }
  0xe8   :  { %125 = vsyncpa [#allocation5], 1 }

</bundles_post_ra>
